<compile_context>
chip_gen: v7x
topology: tpu7x:2x2x1
jax: 0.10.0
libtpu: 0.0.40
codegen_flags: <defaults>
</compile_context>

<pallas_src>
import jax
import jax.numpy as jnp
from jax.experimental import pallas as pl
from jax.experimental.pallas import tpu as pltpu

IN_FEATURES = 28 * 28          # 784
OUT_FEATURES = 10
OUT_PAD = 128                  # lane-dense output width


def _round_up(x, m):
    return ((x + m - 1) // m) * m


def mlp_kernel(x_ref, w1_ref, b1_ref, w2_ref, b2_ref,
               w3_ref, b3_ref, w4_ref, b4_ref, o_ref):
    # Cast the streamed f32 tile to bf16 on the VPU (hidden under DMA).
    x = x_ref[...].astype(jnp.bfloat16)

    # Layer 1: (TB, 784) bf16 @ (784, 16) bf16 -> f32 accumulate on MXU.
    h = jnp.dot(x, w1_ref[...], preferred_element_type=jnp.float32)
    h = jnp.maximum(h + b1_ref[...], 0.0)

    # Layers 2-3: tiny; keep dots bf16 x bf16 with f32 accumulation.
    h = jnp.dot(h.astype(jnp.bfloat16), w2_ref[...],
                preferred_element_type=jnp.float32)
    h = jnp.maximum(h + b2_ref[...], 0.0)

    h = jnp.dot(h.astype(jnp.bfloat16), w3_ref[...],
                preferred_element_type=jnp.float32)
    h = jnp.maximum(h + b3_ref[...], 0.0)

    # Final layer padded to 128 outputs -> unmasked, lane-dense bf16 store.
    h = jnp.dot(h.astype(jnp.bfloat16), w4_ref[...],
                preferred_element_type=jnp.float32)
    o_ref[...] = jnp.maximum(h + b4_ref[...], 0.0).astype(jnp.bfloat16)


def _choose_batch_tile(B, tb):
    """Pick a batch tile: multiple of 16, >=2 grid steps when possible (v7x)."""
    if B < 16:
        return B                              # single full-array block
    # Aim for at least 2 tiles so v7x can shard across both TensorCores.
    half = _round_up(pl.cdiv(B, 2), 16)
    return max(16, min(tb, half))


def neural_network_forward(x_nchw, params, *, tb=1024):
    """x_nchw: (B, 1, 28, 28) float32 -> logits (B, 10) float32."""
    B = x_nchw.shape[0]
    x = x_nchw.reshape(B, -1)                 # nn.Flatten(): (B, 784), stays f32

    (w1, b1), (w2, b2), (w3, b3), (w4, b4) = params
    w1 = w1.astype(jnp.bfloat16)
    w2 = w2.astype(jnp.bfloat16)
    w3 = w3.astype(jnp.bfloat16)
    # Pad the head to a lane-dense 128-wide output (zeros are sliced off).
    w4p = jnp.pad(w4, ((0, 0), (0, OUT_PAD - w4.shape[1]))).astype(jnp.bfloat16)
    b4p = jnp.pad(b4, ((0, 0), (0, OUT_PAD - b4.shape[1])))   # stays f32

    TB = _choose_batch_tile(B, tb)
    grid = (pl.cdiv(B, TB),)                  # ragged last tile; no jnp.pad of x

    resident = lambda i: (0, 0)               # weights/biases: same block every step

    weight_bytes = sum(int(a.size) * a.dtype.itemsize
                       for a in (w1, b1, w2, b2, w3, b3, w4p, b4p))
    cost = pl.CostEstimate(
        flops=2 * B * (IN_FEATURES * 16 + 16 * 16 + 16 * 16 + 16 * OUT_PAD),
        transcendentals=0,
        bytes_accessed=B * IN_FEATURES * 4 + B * OUT_PAD * 2 + weight_bytes,
    )

    out = pl.pallas_call(
        mlp_kernel,
        out_shape=jax.ShapeDtypeStruct((B, OUT_PAD), jnp.bfloat16),
        grid=grid,
        in_specs=[
            pl.BlockSpec((TB, IN_FEATURES), lambda i: (i, 0)),   # x (streamed, f32)
            pl.BlockSpec(w1.shape, resident),                    # w1
            pl.BlockSpec(b1.shape, resident),                    # b1
            pl.BlockSpec(w2.shape, resident),                    # w2
            pl.BlockSpec(b2.shape, resident),                    # b2
            pl.BlockSpec(w3.shape, resident),                    # w3
            pl.BlockSpec(b3.shape, resident),                    # b3
            pl.BlockSpec(w4p.shape, resident),                   # w4 (padded)
            pl.BlockSpec(b4p.shape, resident),                   # b4 (padded)
        ],
        out_specs=pl.BlockSpec((TB, OUT_PAD), lambda i: (i, 0)),
        compiler_params=pltpu.CompilerParams(
            dimension_semantics=("parallel",),
            vmem_limit_bytes=32 * 1024 * 1024),
        cost_estimate=cost,
    )(x, w1, b1, w2, b2, w3, b3, w4p, b4p)

    return out[:, :OUT_FEATURES].astype(jnp.float32)


def init_params(key):
    """Deterministic synthetic params mimicking nn.Linear uniform init.

    Weights shaped (in_features, out_features); biases shaped (1, out_features)
    so x @ W + b inside the kernel matches PyTorch's x @ W_pt.T + b.
    """
    dims = [(IN_FEATURES, 16), (16, 16), (16, 16), (16, OUT_FEATURES)]
    params = []
    for (fin, fout) in dims:
        key, kw, kb = jax.random.split(key, 3)
        bound = 1.0 / jnp.sqrt(fin)
        w = jax.random.uniform(kw, (fin, fout), jnp.float32, -bound, bound)
        b = jax.random.uniform(kb, (1, fout), jnp.float32, -bound, bound)
        params.append((w, b))
    return params


def reference_forward(x_nchw, params):
    """Pure-JAX reference mirroring the kernel's precision (bf16 in, f32 acc)."""
    h = x_nchw.reshape(x_nchw.shape[0], -1).astype(jnp.bfloat16)
    for (w, b) in params:
        a = jnp.dot(h, w.astype(jnp.bfloat16),
                    preferred_element_type=jnp.float32)
        a = jnp.maximum(a + b, 0.0)
        h = a.astype(jnp.bfloat16)
    return h.astype(jnp.float32)   # final logits, bf16-rounded like the kernel


if __name__ == "__main__":
    key = jax.random.PRNGKey(0)
    kx, kp = jax.random.split(key)

    # Small batch of MNIST-shaped inputs in [0, 1], NCHW like the PyTorch module.
    x = jax.random.uniform(kx, (2, 1, 28, 28), jnp.float32, 0.0, 1.0)
    params = init_params(kp)

    logits = neural_network_forward(x, params)
    logits = jax.block_until_ready(logits)

    ref = reference_forward(x, params)
    assert logits.shape == (2, 10)
    # bf16 output (and bf16 weights/inputs) => ~3 decimal digits of precision.
    assert jnp.allclose(logits, ref, atol=2e-2, rtol=2e-2)

    print("KERNEL_OK")
</pallas_src>

<mosaic_0001>
module attributes {stable_mosaic.version = 11 : i64} {
  func.func @mlp_kernel(%arg0: i32, %arg1: memref<2x784xf32, #tpu.memory_space<vmem>>, %arg2: memref<784x16xbf16, #tpu.memory_space<vmem>>, %arg3: memref<1x16xf32, #tpu.memory_space<vmem>>, %arg4: memref<16x16xbf16, #tpu.memory_space<vmem>>, %arg5: memref<1x16xf32, #tpu.memory_space<vmem>>, %arg6: memref<16x16xbf16, #tpu.memory_space<vmem>>, %arg7: memref<1x16xf32, #tpu.memory_space<vmem>>, %arg8: memref<16x128xbf16, #tpu.memory_space<vmem>>, %arg9: memref<1x128xf32, #tpu.memory_space<vmem>>, %arg10: memref<2x128xbf16, #tpu.memory_space<vmem>>) attributes {dimension_semantics = [#tpu.dimension_semantics<parallel>], iteration_bounds = array<i64: 1>, scalar_prefetch = 0 : i64, scratch_operands = 0 : i64, tpu.core_type = #tpu.core_type<tc>, window_params = [{transform_indices = @transform_0, window_bounds = array<i64: 2, 784>}, {pipeline_mode = #tpu.pipeline_mode<synchronous>, transform_indices = @transform_1, window_bounds = array<i64: 784, 16>}, {pipeline_mode = #tpu.pipeline_mode<synchronous>, transform_indices = @transform_2, window_bounds = array<i64: 1, 16>}, {pipeline_mode = #tpu.pipeline_mode<synchronous>, transform_indices = @transform_3, window_bounds = array<i64: 16, 16>}, {pipeline_mode = #tpu.pipeline_mode<synchronous>, transform_indices = @transform_4, window_bounds = array<i64: 1, 16>}, {pipeline_mode = #tpu.pipeline_mode<synchronous>, transform_indices = @transform_5, window_bounds = array<i64: 16, 16>}, {pipeline_mode = #tpu.pipeline_mode<synchronous>, transform_indices = @transform_6, window_bounds = array<i64: 1, 16>}, {pipeline_mode = #tpu.pipeline_mode<synchronous>, transform_indices = @transform_7, window_bounds = array<i64: 16, 128>}, {pipeline_mode = #tpu.pipeline_mode<synchronous>, transform_indices = @transform_8, window_bounds = array<i64: 1, 128>}, {transform_indices = @transform_9, window_bounds = array<i64: 2, 128>}]} {
    %c0 = arith.constant 0 : index
    %c0_0 = arith.constant 0 : index
    %0 = vector.load %arg1[%c0, %c0_0] : memref<2x784xf32, #tpu.memory_space<vmem>>, vector<2x784xf32>
    %1 = arith.truncf %0 : vector<2x784xf32> to vector<2x784xbf16>
    %c0_1 = arith.constant 0 : index
    %c0_2 = arith.constant 0 : index
    %2 = vector.load %arg2[%c0_1, %c0_2] : memref<784x16xbf16, #tpu.memory_space<vmem>>, vector<784x16xbf16>
    %cst = arith.constant dense<0.000000e+00> : vector<2x16xf32>
    %3 = tpu.matmul %1, %2, %cst {dimension_numbers = #tpu.dot_dimension_numbers<[1], [0], [0], [1], [0, 0, 1, 1], [], []>} : vector<2x784xbf16>, vector<784x16xbf16>, vector<2x16xf32> -> vector<2x16xf32>
    %c0_3 = arith.constant 0 : index
    %c0_4 = arith.constant 0 : index
    %4 = vector.load %arg3[%c0_3, %c0_4] : memref<1x16xf32, #tpu.memory_space<vmem>>, vector<1x16xf32>
    %5 = vector.broadcast %4 : vector<1x16xf32> to vector<2x16xf32>
    %6 = arith.addf %3, %5 : vector<2x16xf32>
    %cst_5 = arith.constant 0.000000e+00 : f32
    %7 = vector.broadcast %cst_5 : f32 to vector<2x16xf32>
    %8 = arith.maximumf %6, %7 : vector<2x16xf32>
    %9 = arith.truncf %8 : vector<2x16xf32> to vector<2x16xbf16>
    %c0_6 = arith.constant 0 : index
    %c0_7 = arith.constant 0 : index
    %10 = vector.load %arg4[%c0_6, %c0_7] : memref<16x16xbf16, #tpu.memory_space<vmem>>, vector<16x16xbf16>
    %cst_8 = arith.constant dense<0.000000e+00> : vector<2x16xf32>
    %11 = tpu.matmul %9, %10, %cst_8 {dimension_numbers = #tpu.dot_dimension_numbers<[1], [0], [0], [1], [0, 0, 1, 1], [], []>} : vector<2x16xbf16>, vector<16x16xbf16>, vector<2x16xf32> -> vector<2x16xf32>
    %c0_9 = arith.constant 0 : index
    %c0_10 = arith.constant 0 : index
    %12 = vector.load %arg5[%c0_9, %c0_10] : memref<1x16xf32, #tpu.memory_space<vmem>>, vector<1x16xf32>
    %13 = vector.broadcast %12 : vector<1x16xf32> to vector<2x16xf32>
    %14 = arith.addf %11, %13 : vector<2x16xf32>
    %cst_11 = arith.constant 0.000000e+00 : f32
    %15 = vector.broadcast %cst_11 : f32 to vector<2x16xf32>
    %16 = arith.maximumf %14, %15 : vector<2x16xf32>
    %17 = arith.truncf %16 : vector<2x16xf32> to vector<2x16xbf16>
    %c0_12 = arith.constant 0 : index
    %c0_13 = arith.constant 0 : index
    %18 = vector.load %arg6[%c0_12, %c0_13] : memref<16x16xbf16, #tpu.memory_space<vmem>>, vector<16x16xbf16>
    %cst_14 = arith.constant dense<0.000000e+00> : vector<2x16xf32>
    %19 = tpu.matmul %17, %18, %cst_14 {dimension_numbers = #tpu.dot_dimension_numbers<[1], [0], [0], [1], [0, 0, 1, 1], [], []>} : vector<2x16xbf16>, vector<16x16xbf16>, vector<2x16xf32> -> vector<2x16xf32>
    %c0_15 = arith.constant 0 : index
    %c0_16 = arith.constant 0 : index
    %20 = vector.load %arg7[%c0_15, %c0_16] : memref<1x16xf32, #tpu.memory_space<vmem>>, vector<1x16xf32>
    %21 = vector.broadcast %20 : vector<1x16xf32> to vector<2x16xf32>
    %22 = arith.addf %19, %21 : vector<2x16xf32>
    %cst_17 = arith.constant 0.000000e+00 : f32
    %23 = vector.broadcast %cst_17 : f32 to vector<2x16xf32>
    %24 = arith.maximumf %22, %23 : vector<2x16xf32>
    %25 = arith.truncf %24 : vector<2x16xf32> to vector<2x16xbf16>
    %c0_18 = arith.constant 0 : index
    %c0_19 = arith.constant 0 : index
    %26 = vector.load %arg8[%c0_18, %c0_19] : memref<16x128xbf16, #tpu.memory_space<vmem>>, vector<16x128xbf16>
    %cst_20 = arith.constant dense<0.000000e+00> : vector<2x128xf32>
    %27 = tpu.matmul %25, %26, %cst_20 {dimension_numbers = #tpu.dot_dimension_numbers<[1], [0], [0], [1], [0, 0, 1, 1], [], []>} : vector<2x16xbf16>, vector<16x128xbf16>, vector<2x128xf32> -> vector<2x128xf32>
    %c0_21 = arith.constant 0 : index
    %c0_22 = arith.constant 0 : index
    %28 = vector.load %arg9[%c0_21, %c0_22] : memref<1x128xf32, #tpu.memory_space<vmem>>, vector<1x128xf32>
    %29 = vector.broadcast %28 : vector<1x128xf32> to vector<2x128xf32>
    %30 = arith.addf %27, %29 : vector<2x128xf32>
    %cst_23 = arith.constant 0.000000e+00 : f32
    %31 = vector.broadcast %cst_23 : f32 to vector<2x128xf32>
    %32 = arith.maximumf %30, %31 : vector<2x128xf32>
    %33 = arith.truncf %32 : vector<2x128xf32> to vector<2x128xbf16>
    %c0_24 = arith.constant 0 : index
    %c0_25 = arith.constant 0 : index
    %34 = vector.load %arg10[%c0_24, %c0_25] : memref<2x128xbf16, #tpu.memory_space<vmem>>, vector<2x128xbf16>
    tpu.vector_store %arg10[%c0_24, %c0_25], %33 {strides = array<i32>} : memref<2x128xbf16, #tpu.memory_space<vmem>>, vector<2x128xbf16>,
    return
  }
  func.func @transform_0(%arg0: i32) -> (i32, i32) {
    %c0_i32 = arith.constant 0 : i32
    %c0_i32_0 = arith.constant 0 : i32
    return %arg0, %c0_i32 : i32, i32
  }
  func.func @transform_1(%arg0: i32) -> (i32, i32) {
    %c0_i32 = arith.constant 0 : i32
    %c0_i32_0 = arith.constant 0 : i32
    %c0_i32_1 = arith.constant 0 : i32
    return %c0_i32, %c0_i32_0 : i32, i32
  }
  func.func @transform_2(%arg0: i32) -> (i32, i32) {
    %c0_i32 = arith.constant 0 : i32
    %c0_i32_0 = arith.constant 0 : i32
    %c0_i32_1 = arith.constant 0 : i32
    return %c0_i32, %c0_i32_0 : i32, i32
  }
  func.func @transform_3(%arg0: i32) -> (i32, i32) {
    %c0_i32 = arith.constant 0 : i32
    %c0_i32_0 = arith.constant 0 : i32
    %c0_i32_1 = arith.constant 0 : i32
    return %c0_i32, %c0_i32_0 : i32, i32
  }
  func.func @transform_4(%arg0: i32) -> (i32, i32) {
    %c0_i32 = arith.constant 0 : i32
    %c0_i32_0 = arith.constant 0 : i32
    %c0_i32_1 = arith.constant 0 : i32
    return %c0_i32, %c0_i32_0 : i32, i32
  }
  func.func @transform_5(%arg0: i32) -> (i32, i32) {
    %c0_i32 = arith.constant 0 : i32
    %c0_i32_0 = arith.constant 0 : i32
    %c0_i32_1 = arith.constant 0 : i32
    return %c0_i32, %c0_i32_0 : i32, i32
  }
  func.func @transform_6(%arg0: i32) -> (i32, i32) {
    %c0_i32 = arith.constant 0 : i32
    %c0_i32_0 = arith.constant 0 : i32
    %c0_i32_1 = arith.constant 0 : i32
    return %c0_i32, %c0_i32_0 : i32, i32
  }
  func.func @transform_7(%arg0: i32) -> (i32, i32) {
    %c0_i32 = arith.constant 0 : i32
    %c0_i32_0 = arith.constant 0 : i32
    %c0_i32_1 = arith.constant 0 : i32
    return %c0_i32, %c0_i32_0 : i32, i32
  }
  func.func @transform_8(%arg0: i32) -> (i32, i32) {
    %c0_i32 = arith.constant 0 : i32
    %c0_i32_0 = arith.constant 0 : i32
    %c0_i32_1 = arith.constant 0 : i32
    return %c0_i32, %c0_i32_0 : i32, i32
  }
  func.func @transform_9(%arg0: i32) -> (i32, i32) {
    %c0_i32 = arith.constant 0 : i32
    %c0_i32_0 = arith.constant 0 : i32
    return %arg0, %c0_i32 : i32, i32
  }
}

</mosaic_0001>

<bundles_post_ra>
// kernel: tpu_custom_call.1
= control target key start
LH: loop header
LB: loop body
LE: loop exit
PB: predicated region body
PF: predicated region fallthrough
CT: control target
= control target key end

     0   :  { %v42_v27 = vlaneseq  ;;  %v1085_v35 = vmov 1983009808   ;;  %v1086_v40 = vmov 0.0   ;;  %vm1087_vm0 = vmmov 0   ;;  %s1341_s0 = inlined_call_operand.vmem [shape: f32[2,784], index: 0, kind: input, shape index: {}]   ;;  %s1342_s1 = inlined_call_operand.vmem [shape: bf16[784,16], index: 1, kind: input, shape index: {}]   ;;  %s1343_s2 = inlined_call_operand.vmem [shape: f32[1,16], index: 2, kind: input, shape index: {}]   ;;  %s1344_s3 = inlined_call_operand.vmem [shape: bf16[16,16], index: 3, kind: input, shape index: {}]   ;;  %s1345_s4 = inlined_call_operand.vmem [shape: f32[1,16], index: 4, kind: input, shape index: {}]   ;;  %s1346_s5 = inlined_call_operand.vmem [shape: bf16[16,16], index: 5, kind: input, shape index: {}]   ;;  %s1347_s6 = inlined_call_operand.vmem [shape: f32[1,16], index: 6, kind: input, shape index: {}]   ;;  %s1348_s7 = inlined_call_operand.vmem [shape: bf16[16,128], index: 7, kind: input, shape index: {}]   ;;  %s1349_s8 = inlined_call_operand.vmem [shape: f32[1,128], index: 8, kind: input, shape index: {}]   ;;  %s1350_s9 = inlined_call_operand.hbm [shape: bf16[2,128], index: 9, kind: output, shape index: {}]  }
   0x1   :  { %v1007_v0 = vld [vmem:[%s1342_s1 + $0x40] sm:$0xff]   ;;  %v1011_v4 = vld [vmem:[%s1342_s1 + $0x48] sm:$0xff]   ;;  %v1015_v8 = vld [vmem:[%s1342_s1 + $0x50] sm:$0xff]   ;;  %v40_v36 = vunpack.c.l.s4 %v1085_v35 }
   0x2   :  { %v1008_v1 = vld [vmem:[%s1342_s1] sm:$0xff]   ;;  %905 = vmatprep.subr.bf16.mxu0 %v1007_v0  ;;  %v1012_v5 = vld [vmem:[%s1342_s1 + $0x8] sm:$0xff]   ;;  %v1016_v9 = vld [vmem:[%s1342_s1 + $0x10] sm:$0xff]   ;;  %v43_v32 = vshrl.u32 %v42_v27, 7 }
   0x3   :  { %v1009_v2 = vld [vmem:[%s1342_s1 + $0xc0] sm:$0xff]   ;;  %906 = vmatpush3.bf16.msra.mxu0 %v1008_v1  ;;  %v1013_v6 = vld [vmem:[%s1342_s1 + $0xc8] sm:$0xff]   ;;  %v1017_v10 = vld [vmem:[%s1342_s1 + $0xd0] sm:$0xff]   ;;  %v41_v38 = vunpack.c.0.s8 %v40_v36 }
   0x4   :  { %v1010_v3 = vld [vmem:[%s1342_s1 + $0x80] sm:$0xff]   ;;  %927 = vmatprep.subr.bf16.mxu1 %v1009_v2  ;;  %907 = vmatprep.subr.bf16.mxu0 %v1011_v4  ;;  %v1014_v7 = vld [vmem:[%s1342_s1 + $0x88] sm:$0xff]   ;;  %v1018_v11 = vld [vmem:[%s1342_s1 + $0x90] sm:$0xff]  }
   0x5   :  { %928 = vmatpush3.bf16.msra.mxu1 %v1010_v3  ;;  %v1019_v12 = vld [vmem:[%s1342_s1 + $0x58] sm:$0xff]   ;;  %v1023_v16 = vld [vmem:[%s1342_s1 + $0x60] sm:$0xff]   ;;  %v1027_v20 = vld [vmem:[%s1342_s1 + $0x68] sm:$0xff]   ;;  %v44_v41 = vsub.s32 %v41_v38, %v43_v32 }
   0x6   :  { %929 = vmatprep.subr.bf16.mxu1 %v1013_v6  ;;  %v1020_v13 = vld [vmem:[%s1342_s1 + $0x18] sm:$0xff]   ;;  %v1024_v17 = vld [vmem:[%s1342_s1 + $0x20] sm:$0xff]   ;;  %v1028_v21 = vld [vmem:[%s1342_s1 + $0x28] sm:$0xff]  }
   0x7   :  { %908 = vmatpush3.bf16.msra.mxu0 %v1012_v5  ;;  %v1021_v14 = vld [vmem:[%s1342_s1 + $0xd8] sm:$0xff]   ;;  %v1025_v18 = vld [vmem:[%s1342_s1 + $0xe0] sm:$0xff]   ;;  %v1029_v22 = vld [vmem:[%s1342_s1 + $0xe8] sm:$0xff]  }
   0x8   :  { %909 = vmatprep.subr.bf16.mxu0 %v1015_v8  ;;  %v1022_v15 = vld [vmem:[%s1342_s1 + $0x98] sm:$0xff]   ;;  %v1026_v19 = vld [vmem:[%s1342_s1 + $0xa0] sm:$0xff]   ;;  %v1030_v23 = vld [vmem:[%s1342_s1 + $0xa8] sm:$0xff]  }
   0x9   :  { %930 = vmatpush3.bf16.msra.mxu1 %v1014_v7  ;;  %v1031_v24 = vld [vmem:[%s1342_s1 + $0x70] sm:$0xff]   ;;  %v1035_v29 = vld [vmem:[%s1342_s1 + $0x78] sm:$0xff]   ;;  %v34_v33 = vld [vmem:[%s1341_s0] sm:$0xff] }
   0xa   :  { %931 = vmatprep.subr.bf16.mxu1 %v1017_v10  ;;  %v1032_v25 = vld [vmem:[%s1342_s1 + $0x30] sm:$0xff]   ;;  %v1036_v30 = vld [vmem:[%s1342_s1 + $0x38] sm:$0xff]   ;;  %v1039_v37 = vld [vmem:[%s1342_s1 + $0x140] sm:$0xff]   ;;  %v38_v39 = vcombine.high %v34_v33, %v34_v33  ;;  %v45_v42 = vrot.slane %v34_v33, %v44_v41 }
   0xb   :  { %910 = vmatpush3.bf16.msra.mxu0 %v1016_v9  ;;  %v1033_v26 = vld [vmem:[%s1342_s1 + $0xf0] sm:$0xff]   ;;  %v1037_v31 = vld [vmem:[%s1342_s1 + $0xf8] sm:$0xff]   ;;  %v1041_v50 = vld [vmem:[%s1342_s1 + $0x100] sm:$0xff]  }
   0xc   :  { %911 = vmatprep.subr.bf16.mxu0 %v1019_v12  ;;  %v1034_v28 = vld [vmem:[%s1342_s1 + $0xb0] sm:$0xff]   ;;  %v1038_v34 = vld [vmem:[%s1342_s1 + $0xb8] sm:$0xff]   ;;  %v52_v43 = vrot.slane %v38_v39, %v44_v41  ;;  %v53_v44 = vcombine.high %v45_v42, %v45_v42  ;;  %v78_v46 = vpack.c.bf16 %v45_v42, %v45_v42  ;;  %v1042_v51 = vld [vmem:[%s1342_s1 + $0x148] sm:$0xff]  }
   0xd   :  { %932 = vmatpush3.bf16.msra.mxu1 %v1018_v11  ;;  %v1043_v52 = vld [vmem:[%s1342_s1 + $0x108] sm:$0xff]   ;;  %v1044_v53 = vld [vmem:[%s1342_s1 + $0x150] sm:$0xff]   ;;  %v1046_v55 = vld [vmem:[%s1342_s1 + $0x158] sm:$0xff]  }
   0xe   :  { %933 = vmatprep.subr.bf16.mxu1 %v1021_v14  ;;  %v54_v45 = vcombine.high %v52_v43, %v52_v43  ;;  %v80_v47 = vpack.c.bf16 %v52_v43, %v52_v43  ;;  %v79_v48 = vpack.c.bf16 %v53_v44, %v53_v44  ;;  %v1045_v54 = vld [vmem:[%s1342_s1 + $0x110] sm:$0xff]   ;;  %v1056_v56 = vld [vmem:[%s1342_s1 + $0x180] sm:$0xff]   ;;  %v35_v57 = vld [vmem:[%s1341_s0 + $0x8] sm:$0x3f] }
   0xf   :  { %912 = vmatpush3.bf16.msra.mxu0 %v1020_v13  ;;  %v55_v58 = vcombine.high %v35_v57, %v35_v57  ;;  %v62_v59 = vrot.slane %v35_v57, %v44_v41 }
  0x10   :  { %913 = vmatprep.subr.bf16.mxu0 %v1023_v16  ;;  %v81_v49 = vpack.c.bf16 %v54_v45, %v54_v45  ;;  %520 = vmatprep.mubr.bf16.mxu0 %v79_v48 }
  0x11   :  { %934 = vmatpush3.bf16.msra.mxu1 %v1022_v15 }
  0x12   :  { %935 = vmatprep.subr.bf16.mxu1 %v1025_v18  ;;  %560 = vmatprep.mubr.bf16.mxu1 %v81_v49 }
  0x13   :  { %914 = vmatpush3.bf16.msra.mxu0 %v1024_v17 }
  0x14   :  { %915 = vmatprep.subr.bf16.mxu0 %v1027_v20 }
  0x15   :  { %936 = vmatpush3.bf16.msra.mxu1 %v1026_v19 }
  0x16   :  { %937 = vmatprep.subr.bf16.mxu1 %v1029_v22 }
  0x17   :  { %916 = vmatpush3.bf16.msra.mxu0 %v1028_v21 }
  0x18   :  { %917 = vmatprep.subr.bf16.mxu0 %v1031_v24 }
  0x19   :  { %938 = vmatpush3.bf16.msra.mxu1 %v1030_v23 }
  0x1a   :  { %939 = vmatprep.subr.bf16.mxu1 %v1033_v26 }
  0x1b   :  { %918 = vmatpush3.bf16.msra.mxu0 %v1032_v25 }
  0x1c   :  { %919 = vmatprep.subr.bf16.mxu0 %v1035_v29 }
  0x1d   :  { %940 = vmatpush3.bf16.msra.mxu1 %v1034_v28 }
  0x1e   :  { %941 = vmatprep.subr.bf16.mxu1 %v1037_v31 }
  0x1f   :  { %920 = vmatpush3.bf16.msra.mxu0 %v1036_v30 }
  0x20   :  { %949 = vmatprep.subr.bf16.mxu0 %v1039_v37 }
  0x21   :  { %942 = vmatpush3.bf16.msra.mxu1 %v1038_v34 }
  0x22   :  { %979 = vmatprep.subr.bf16.mxu1 %v1086_v40  ;;  %521 = vmatmul.mubr.bf16.vlgmr.msra.gmra.mrb[0].mxu0 %v78_v46 }
  0x23   :  { %950 = vmatpush3.bf16.msra.mxu0 %v1041_v50 }
  0x24   :  { %561 = vmatmul.mubr.bf16.vlgmr.msra.gmra.mrb[0].mxu1 %v80_v47  ;;  %951 = vmatprep.subr.bf16.mxu0 %v1042_v51 }
  0x25   :  { %981 = vmatprep.mubr.msk.bf16.mxu1 %vm1087_vm0, %v1086_v40  ;;  %980 = vmatpush3.bf16.msra.mxu1 %v1056_v56 }
  0x27   :  { %952 = vmatpush3.bf16.msra.mxu0 %v1043_v52 }
  0x28   :  { %953 = vmatprep.subr.bf16.mxu0 %v1044_v53 }
  0x29   :  { %14 = vsyncpa [#allocation3], 0  ;;  %v69_v60 = vrot.slane %v55_v58, %v44_v41  ;;  %v70_v61 = vcombine.high %v62_v59, %v62_v59  ;;  %985 = vmatprep.subr.bf16.mxu1 %v1086_v40  ;;  %vm484_vm1 = vcmask 130048   ;;  %v1047_v62 = vld [vmem:[%s1342_s1 + $0x118] sm:$0xff]   ;;  %v1048_v1 = vld [vmem:[%s1342_s1 + $0x160] sm:$0xff]   ;;  %v82_v9 = vpack.c.bf16 %v62_v59, %v62_v59  ;;  %s1088_s12 = smov [#allocation2]  }
  0x2a   :  { %v1049_v2 = vld [vmem:[%s1342_s1 + $0x120] sm:$0xff]   ;;  %v1050_v3 = vld [vmem:[%s1342_s1 + $0x168] sm:$0xff]   ;;  %v1052_v5 = vld [vmem:[%s1342_s1 + $0x170] sm:$0xff]   ;;  %s837_s13 = sshll.u32 %s1088_s12, 4  ;;  %s838_s13 = int_to_ptr.vmem [resolvable:$true] %s837_s13 }
  0x2b   :  { %954 = vmatpush3.bf16.msra.mxu0 %v1045_v54  ;;  %v83_v63 = vpack.c.bf16 %v70_v61, %v70_v61  ;;  %v84_v0 = vpack.c.bf16 %v69_v60, %v69_v60  ;;  %v1051_v4 = vld [vmem:[%s1342_s1 + $0x128] sm:$0xff]   ;;  %v1053_v6 = vld [vmem:[%s1342_s1 + $0x130] sm:$0xff]   ;;  %v1054_v7 = vld [vmem:[%s1342_s1 + $0x178] sm:$0xff]   ;;  %s1065_s14 = scalar_lea.vmem %s838_s13, 32  ;;  %p1066_p1 = scmp.lt.s32.totalorder %s838_s13, %s838_s13 }
  0x2c   :  { %955 = vmatprep.subr.bf16.mxu0 %v1046_v55  ;;  %v1055_v8 = vld [vmem:[%s1342_s1 + $0x138] sm:$0xff]   ;;  %v1058_v10 = vld [vmem:[%s1344_s3] sm:$0xff]  }
  0x2d   :  { %600 = vmatprep.mubr.bf16.mxu0 %v83_v63  ;;  %982 = vmatmul.mubr.msk.bf16.vlgmr.msra.gmra.mrb[4].mxu1 %vm484_vm1, %v84_v0  ;;  %v845_v13 = vld [vmem:[%s1343_s2] ss:$0 sm:$0xff] }
  0x2e   :  { %987 = vmatprep.mubr.msk.bf16.mxu1 %vm1087_vm0, %v1086_v40  ;;  %986 = vmatpush3.bf16.msra.mxu1 %v1058_v10  ;;  %v1059_v36 = vld [vmem:[%s1346_s5] sm:$0xff]  }
  0x2f   :  { %956 = vmatpush3.bf16.msra.mxu0 %v1047_v62  ;;  %991 = vmatprep.subr.bf16.mxu1 %v1086_v40  ;;  %v896_v38 = vld [vmem:[%s1345_s4] ss:$0 sm:$0xff] }
  0x30   :  { %957 = vmatprep.subr.bf16.mxu0 %v1048_v1  ;;  %v1060_v46 = vld [vmem:[%s1348_s7] sm:$0xff]  }
  0x31   :  { %v899_v48 = vld [vmem:[%s1347_s6] ss:$0 sm:$0xff]  ;;  %s1061_s6 = scalar_lea.vmem %s838_s13, 16 }
  0x32   :  { %v902_v56 = vld [vmem:[%s1349_s8] ss:$0 sm:$0xff]  ;;  %p1062_p0 = scmp.ne.s32.totalorder %s838_s13, %s1061_s6  ;;  %p1067_p2 = scmp.lt.s32.totalorder %s1065_s14, %s1061_s6 }
  0x33   :  { %958 = vmatpush3.bf16.msra.mxu0 %v1049_v2 }
  0x34   :  { %959 = vmatprep.subr.bf16.mxu0 %v1050_v3  ;;  %p1068_p3 = por %p1067_p2, %p1066_p1 }
  0x36   :  { %p1069_p4 = pnand %p1068_p3, %p1062_p0 }
  0x37   :  { %960 = vmatpush3.bf16.msra.mxu0 %v1051_v4 }
  0x38   :  { %961 = vmatprep.subr.bf16.mxu0 %v1052_v5 }
  0x3b   :  { %962 = vmatpush3.bf16.msra.mxu0 %v1053_v6 }
  0x3c   :  { %963 = vmatprep.subr.bf16.mxu0 %v1054_v7 }
  0x3f   :  { %964 = vmatpush3.bf16.msra.mxu0 %v1055_v8 }
  0x42   :  { %601 = vmatmul.mubr.bf16.vlgmr.msra.gmra.mrb[4].mxu0 %v82_v9 }
  0xf5   :  { %v921_v11 = vpop.f32.mrb[0].mxu0 }
  0xf6   :  { %v922_v14 = vpop.f32.mrb[1].mxu0 }
  0xf7   :  { %v943_v12 = vpop.f32.mrb[0].mxu1  ;;  %v923_v16 = vadd.f32 %v922_v14, %v921_v11  ;;  %v924_v17 = vpop.f32.mrb[2].mxu0 }
  0xf8   :  { %v944_v15 = vpop.f32.mrb[1].mxu1  ;;  %v925_v20 = vpop.f32.mrb[3].mxu0 }
  0xf9   :  { %v945_v18 = vadd.f32 %v944_v15, %v943_v12  ;;  %v946_v19 = vpop.f32.mrb[2].mxu1  ;;  %v523_v22 = vadd.f32 %v923_v16, %v845_v13 }
  0xfa   :  { %v947_v21 = vpop.f32.mrb[3].mxu1 }
  0xfb   :  { %v563_v23 = vadd.f32 %v945_v18, %v523_v22 }
 0x100   :  { %v642_v24 = vpop.f32.mrb[4].mxu1 }
 0x101   :  { %v983_v25 = vpop.f32.mrb[5].mxu1 }
 0x102   :  { %v645_v26 = vpop.f32.mrb[6].mxu1 }
 0x103   :  { %v984_v27 = vpop.f32.mrb[7].mxu1 }
 0x115   :  { %v965_v28 = vpop.f32.mrb[4].mxu0 }
 0x116   :  { %v966_v29 = vpop.f32.mrb[5].mxu0 }
 0x117   :  { %v967_v30 = vadd.f32 %v966_v29, %v965_v28  ;;  %v968_v31 = vpop.f32.mrb[6].mxu0 }
 0x118   :  { %v969_v32 = vpop.f32.mrb[7].mxu0 }
 0x119   :  { %v603_v33 = vadd.f32 %v967_v30, %v563_v23 }
 0x11b   :  { %v643_v34 = vadd.f32 %v642_v24, %v603_v33 }
 0x11d   :  { %v648_v35 = vmax.f32 %v643_v34, 0.0 }
 0x11f   :  { %v649_v37 = vpack.c.bf16 %v648_v35, %v648_v35 }
 0x121   :  { %988 = vmatmul.mubr.msk.bf16.vlgmr.msra.gmra.mrb[8].mxu1 %vm484_vm1, %v649_v37 }
 0x122   :  { %992 = vmatpush3.bf16.msra.mxu1 %v1059_v36  ;;  %993 = vmatprep.mubr.msk.bf16.mxu1 %vm1087_vm0, %v1086_v40 }
 0x123   :  { %997 = vmatprep.subr.bf16.mxu1 %v1086_v40 }
 0x1f4   :  { %v702_v39 = vpop.f32.mrb[8].mxu1 }
 0x1f5   :  { %v703_v41 = vadd.f32 %v896_v38, %v702_v39  ;;  %v989_v42 = vpop.f32.mrb[9].mxu1 }
 0x1f6   :  { %v705_v43 = vpop.f32.mrb[10].mxu1 }
 0x1f7   :  { %v708_v44 = vmax.f32 %v703_v41, 0.0  ;;  %v990_v45 = vpop.f32.mrb[11].mxu1 }
 0x1f9   :  { %v709_v47 = vpack.c.bf16 %v708_v44, %v708_v44 }
 0x1fb   :  { %994 = vmatmul.mubr.msk.bf16.vlgmr.msra.gmra.mrb[12].mxu1 %vm484_vm1, %v709_v47 }
 0x1fc   :  { %998 = vmatpush3.bf16.msra.mxu1 %v1060_v46  ;;  %999 = vmatprep.mubr.msk.bf16.mxu1 %vm1087_vm0, %v1086_v40 }
 0x2ce   :  { %v762_v49 = vpop.f32.mrb[12].mxu1 }
 0x2cf   :  { %v763_v50 = vadd.f32 %v899_v48, %v762_v49  ;;  %v995_v51 = vpop.f32.mrb[13].mxu1 }
 0x2d0   :  { %v765_v52 = vpop.f32.mrb[14].mxu1 }
 0x2d1   :  { %v768_v53 = vmax.f32 %v763_v50, 0.0  ;;  %v996_v54 = vpop.f32.mrb[15].mxu1 }
 0x2d3   :  { %v769_v55 = vpack.c.bf16 %v768_v53, %v768_v53 }
 0x2d5   :  { %1000 = vmatmul.mubr.msk.bf16.vlgmr.msra.gmra.mrb[16].mxu1 %vm484_vm1, %v769_v55 }
 0x3a8   :  { %v822_v57 = vpop.f32.mrb[16].mxu1 }
 0x3a9   :  { %v823_v58 = vadd.f32 %v902_v56, %v822_v57  ;;  %v1001_v40 = vpop.f32.mrb[17].mxu1 }
 0x3aa   :  { %v825_v59 = vpop.f32.mrb[18].mxu1 }
 0x3ab   :  { %v828_v60 = vmax.f32 %v823_v58, 0.0  ;;  %v1002_v61 = vpop.f32.mrb[19].mxu1 }
 0x3ad   :  { %v829_v62 = vpack.c.bf16 %v828_v60, %v828_v60 }
 0x3af   :  { %830 = vst [vmem:[#allocation2] sm:$0x1] %v829_v62 }
 0x3b0   :  { %1072 = shalt.err (!%p1069_p4)
}
 0x3b1   :  { %s1073_s16 = scalar_lea.hbm %s1350_s9, 16 }
 0x3b2   :  { %p1074_p5 = scmp.ne.s32.totalorder %s1350_s9, %s1073_s16  ;;  %p1077_p6 = scmp.lt.u32.totalorder %s1073_s16, %s1350_s9 }
 0x3b4   :  { %p1079_p7 = pnand %p1077_p6, %p1074_p5 }
 0x3b6   :  { %1082 = shalt.err (!%p1079_p7)
}
 0x3b7   :  { %840 = dma.vmem_to_hbm [thread:$0]  %s838_s13, 16, %s1350_s9, [#allocation3]  }
 0x3b8   :  { %1083 = dma.done.wait [#allocation3], 16  }
 0x3b9   :  { %1084 = vsyncadd [#allocation3], 4294967280 }
 0x3ba   :  { %844 = vsyncpa [#allocation3], 1 }

</bundles_post_ra>
